<compile_context>
chip_gen: v7x
topology: tpu7x:2x2x1
jax: 0.10.0
libtpu: 0.0.40
codegen_flags: <defaults>
</compile_context>

<pallas_src>
import jax
import jax.numpy as jnp
from jax import lax
from jax.experimental import pallas as pl
from jax.experimental.pallas import tpu as pltpu


def _no_influence_kernel(mask_ref, emb_ref, out_ref):
    # mask_ref: [tb, T]     int32 (nonzero where alignment exists)
    # emb_ref : [T, tb, E]  compute dtype (windowed view of the full embeddings)
    # out_ref : [tb, T*E]   lane-dense output slab (reshaped to [B,T,E] outside)
    T = emb_ref.shape[0]
    E = emb_ref.shape[2]
    zero = jnp.zeros((), dtype=out_ref.dtype)

    if T <= 32:
        # Small static T: fully unrolled, static slices -> unmasked lane-aligned vst.
        for t in range(T):
            emb_t = emb_ref[t]                        # [tb, E] free view on leading dim
            m_t = mask_ref[:, t:t + 1] != 0           # [tb, 1] bool
            out_ref[:, t * E:(t + 1) * E] = jnp.where(m_t, emb_t, zero)
    else:
        # Large T: keep instruction count flat with a rolled loop.
        def body(t, carry):
            emb_t = emb_ref[t]                        # dynamic index on leading dim
            m_t = mask_ref[:, pl.ds(t, 1)] != 0
            off = pl.multiple_of(t * E, 128)          # E % 128 == 0 guaranteed by wrapper
            out_ref[:, pl.ds(off, E)] = jnp.where(m_t, emb_t, zero)
            return carry
        lax.fori_loop(0, T, body, 0)


def _compute_batch_tile(B, T, E, itemsize, *,
                        target_block_bytes=2 << 20, min_grid_steps=8):
    """Batch tile: multiple of the sublane pack, ~2 MiB per buffer, and at least
    `min_grid_steps` grid steps when the batch allows (DMA overlap / megacore)."""
    pack = max(8, 32 // itemsize)              # 8 for f32, 16 for bf16, 32 for i8
    row_bytes = T * E * itemsize               # one batch-row of the emb/out slab
    tb_bytes = (target_block_bytes // max(row_bytes, 1)) // pack * pack
    tb_steps = (B // min_grid_steps) // pack * pack
    tb = min(tb_bytes, tb_steps)
    tb = min(tb, -(-B // pack) * pack)         # never exceed the (rounded-up) batch
    return int(max(pack, tb))


def no_influence_forward(embeddings, train_year, index_list, input_ids,
                         alignment_list, neighbors, *,
                         min_pallas_bytes=1 << 20):
    """Pallas implementation of No_Influence_Model.forward.

    embeddings     : [T_total, N_rows, E] array (embeddings[t] indexed by batch line)
    train_year     : int, number of years T to process (T <= T_total)
    index_list     : unused (kept for signature parity)
    input_ids      : [B] int array, node ids (B <= N_rows)
    alignment_list : [num_nodes, T_total] int array, -1 marks "does not exist"
    neighbors      : unused (kept for signature parity)
    returns        : [B, T, E] in the embeddings' dtype
    """
    del index_list, neighbors  # unused in the reference forward
    T = int(train_year)
    B = int(input_ids.shape[0])
    E = int(embeddings.shape[-1])
    dtype = embeddings.dtype
    itemsize = jnp.dtype(dtype).itemsize

    # Wrapper-side glue: gather alignment rows -> boolean mask (tiny: B*T ints).
    mask = alignment_list[input_ids, :T] != -1                     # [B, T] bool

    out_bytes = B * T * E * itemsize
    use_pallas = (out_bytes >= min_pallas_bytes) and (E % 128 == 0)

    if not use_pallas:
        # Tiny problems / non-lane-aligned E: fused XLA select is strictly faster.
        # TODO(synk): pad E to a multiple of 128 for a Pallas path on awkward widths.
        emb_bt = jnp.transpose(embeddings[:T, :B, :], (1, 0, 2))   # [B, T, E]
        return jnp.where(mask[:, :, None], emb_bt, jnp.zeros((), dtype))

    mask_i32 = mask.astype(jnp.int32)
    tb = _compute_batch_tile(B, T, E, itemsize)
    grid = (pl.cdiv(B, tb),)

    # Honest double-buffered working set + headroom, capped inside v7x's 64 MiB.
    block_bytes = 2 * tb * T * E * itemsize + tb * T * 4
    vmem_limit = int(min(48 << 20, max(16 << 20, 2 * block_bytes + (8 << 20))))
    bytes_accessed = 2 * B * T * E * itemsize + B * T * 4

    out2d = pl.pallas_call(
        _no_influence_kernel,
        out_shape=jax.ShapeDtypeStruct((B, T * E), dtype),
        grid_spec=pltpu.PrefetchScalarGridSpec(
            num_scalar_prefetch=0,
            grid=grid,
            in_specs=[
                # mask values for this batch tile
                pl.BlockSpec((tb, T), lambda i: (i, 0)),
                # window of the FULL embeddings array: years [0,T), batch tile i
                pl.BlockSpec((T, tb, E), lambda i: (0, i, 0)),
            ],
            out_specs=pl.BlockSpec((tb, T * E), lambda i: (i, 0)),
        ),
        compiler_params=pltpu.CompilerParams(
            dimension_semantics=("parallel",),
            vmem_limit_bytes=vmem_limit,
        ),
        cost_estimate=pl.CostEstimate(
            flops=B * T * E, transcendentals=0,
            bytes_accessed=int(bytes_accessed)),
    )(mask_i32, embeddings)

    return out2d.reshape(B, T, E)


if __name__ == "__main__":
    key = jax.random.PRNGKey(0)
    k_emb, k_align, k_ids = jax.random.split(key, 3)

    # Shapes sized so the Pallas path is exercised (output > 1 MiB), with
    # T_total > train_year and N_rows > batch to test the windowed BlockSpec,
    # and batch not a multiple of the tile to test partial-block handling.
    train_year = 8          # T
    total_years = 12        # T_total (embeddings has extra, unused years)
    num_nodes = 64          # rows of alignment_list
    batch = 300             # len(input_ids)  (ragged vs tile size)
    emb_rows = 320          # N_rows > batch
    graph_emb_size = 128    # E

    embeddings = jax.random.normal(
        k_emb, (total_years, emb_rows, graph_emb_size), dtype=jnp.float32)
    # alignment values in [-1, 3); -1 marks "no alignment for this year"
    alignment_list = jax.random.randint(
        k_align, (num_nodes, total_years), -1, 3, dtype=jnp.int32)
    input_ids = jax.random.randint(
        k_ids, (batch,), 0, num_nodes, dtype=jnp.int32)
    index_list = None   # unused by the reference forward
    neighbors = None    # unused by the reference forward

    out = no_influence_forward(embeddings, train_year, index_list, input_ids,
                               alignment_list, neighbors)
    out = jax.block_until_ready(out)

    # Pure-JAX reference check.
    mask = alignment_list[input_ids, :train_year] != -1            # [B, T]
    expected = jnp.where(
        mask[:, :, None],
        jnp.transpose(embeddings[:train_year, :batch, :], (1, 0, 2)),
        0.0)
    assert out.shape == (batch, train_year, graph_emb_size)
    assert jnp.allclose(out, expected), "mismatch vs reference"

    print("KERNEL_OK")
</pallas_src>

<mosaic_0001>
module attributes {stable_mosaic.version = 11 : i64} {
  func.func @_no_influence_kernel(%arg0: i32, %arg1: memref<32x8xi32, #tpu.memory_space<vmem>>, %arg2: memref<8x32x128xf32, #tpu.memory_space<vmem>>, %arg3: memref<32x1024xf32, #tpu.memory_space<vmem>>) attributes {dimension_semantics = [#tpu.dimension_semantics<parallel>], iteration_bounds = array<i64: 10>, scalar_prefetch = 0 : i64, scratch_operands = 0 : i64, tpu.core_type = #tpu.core_type<tc>, window_params = [{transform_indices = @transform_0, window_bounds = array<i64: 32, 8>}, {transform_indices = @transform_1, window_bounds = array<i64: 8, 32, 128>}, {transform_indices = @transform_2, window_bounds = array<i64: 32, 1024>}]} {
    %c0 = arith.constant 0 : index
    %c0_0 = arith.constant 0 : index
    %c0_1 = arith.constant 0 : index
    %0 = vector.load %arg2[%c0, %c0_0, %c0_1] : memref<8x32x128xf32, #tpu.memory_space<vmem>>, vector<1x32x128xf32>
    %1 = vector.shape_cast %0 : vector<1x32x128xf32> to vector<32x128xf32>
    %c0_2 = arith.constant 0 : index
    %c0_3 = arith.constant 0 : index
    %2 = vector.load %arg1[%c0_2, %c0_3] : memref<32x8xi32, #tpu.memory_space<vmem>>, vector<32x1xi32>
    %c0_i32 = arith.constant 0 : i32
    %3 = vector.broadcast %c0_i32 : i32 to vector<32x1xi32>
    %4 = arith.cmpi ne, %2, %3 : vector<32x1xi32>
    %cst = arith.constant 0.000000e+00 : f32
    %5 = vector.shape_cast %4 : vector<32x1xi1> to vector<32x1xi1>
    %6 = vector.broadcast %5 : vector<32x1xi1> to vector<32x128xi1>
    %7 = vector.broadcast %cst : f32 to vector<32x128xf32>
    %8 = arith.select %6, %1, %7 : vector<32x128xi1>, vector<32x128xf32>
    %c0_4 = arith.constant 0 : index
    %c0_5 = arith.constant 0 : index
    %9 = vector.load %arg3[%c0_4, %c0_5] : memref<32x1024xf32, #tpu.memory_space<vmem>>, vector<32x128xf32>
    tpu.vector_store %arg3[%c0_4, %c0_5], %8 {strides = array<i32>} : memref<32x1024xf32, #tpu.memory_space<vmem>>, vector<32x128xf32>,
    %c1 = arith.constant 1 : index
    %c0_6 = arith.constant 0 : index
    %c0_7 = arith.constant 0 : index
    %10 = vector.load %arg2[%c1, %c0_6, %c0_7] : memref<8x32x128xf32, #tpu.memory_space<vmem>>, vector<1x32x128xf32>
    %11 = vector.shape_cast %10 : vector<1x32x128xf32> to vector<32x128xf32>
    %c0_8 = arith.constant 0 : index
    %c1_9 = arith.constant 1 : index
    %12 = vector.load %arg1[%c0_8, %c1_9] : memref<32x8xi32, #tpu.memory_space<vmem>>, vector<32x1xi32>
    %c0_i32_10 = arith.constant 0 : i32
    %13 = vector.broadcast %c0_i32_10 : i32 to vector<32x1xi32>
    %14 = arith.cmpi ne, %12, %13 : vector<32x1xi32>
    %cst_11 = arith.constant 0.000000e+00 : f32
    %15 = vector.shape_cast %14 : vector<32x1xi1> to vector<32x1xi1>
    %16 = vector.broadcast %15 : vector<32x1xi1> to vector<32x128xi1>
    %17 = vector.broadcast %cst_11 : f32 to vector<32x128xf32>
    %18 = arith.select %16, %11, %17 : vector<32x128xi1>, vector<32x128xf32>
    %c0_12 = arith.constant 0 : index
    %c128 = arith.constant 128 : index
    %19 = vector.load %arg3[%c0_12, %c128] : memref<32x1024xf32, #tpu.memory_space<vmem>>, vector<32x128xf32>
    tpu.vector_store %arg3[%c0_12, %c128], %18 {strides = array<i32>} : memref<32x1024xf32, #tpu.memory_space<vmem>>, vector<32x128xf32>,
    %c2 = arith.constant 2 : index
    %c0_13 = arith.constant 0 : index
    %c0_14 = arith.constant 0 : index
    %20 = vector.load %arg2[%c2, %c0_13, %c0_14] : memref<8x32x128xf32, #tpu.memory_space<vmem>>, vector<1x32x128xf32>
    %21 = vector.shape_cast %20 : vector<1x32x128xf32> to vector<32x128xf32>
    %c0_15 = arith.constant 0 : index
    %c2_16 = arith.constant 2 : index
    %22 = vector.load %arg1[%c0_15, %c2_16] : memref<32x8xi32, #tpu.memory_space<vmem>>, vector<32x1xi32>
    %c0_i32_17 = arith.constant 0 : i32
    %23 = vector.broadcast %c0_i32_17 : i32 to vector<32x1xi32>
    %24 = arith.cmpi ne, %22, %23 : vector<32x1xi32>
    %cst_18 = arith.constant 0.000000e+00 : f32
    %25 = vector.shape_cast %24 : vector<32x1xi1> to vector<32x1xi1>
    %26 = vector.broadcast %25 : vector<32x1xi1> to vector<32x128xi1>
    %27 = vector.broadcast %cst_18 : f32 to vector<32x128xf32>
    %28 = arith.select %26, %21, %27 : vector<32x128xi1>, vector<32x128xf32>
    %c0_19 = arith.constant 0 : index
    %c256 = arith.constant 256 : index
    %29 = vector.load %arg3[%c0_19, %c256] : memref<32x1024xf32, #tpu.memory_space<vmem>>, vector<32x128xf32>
    tpu.vector_store %arg3[%c0_19, %c256], %28 {strides = array<i32>} : memref<32x1024xf32, #tpu.memory_space<vmem>>, vector<32x128xf32>,
    %c3 = arith.constant 3 : index
    %c0_20 = arith.constant 0 : index
    %c0_21 = arith.constant 0 : index
    %30 = vector.load %arg2[%c3, %c0_20, %c0_21] : memref<8x32x128xf32, #tpu.memory_space<vmem>>, vector<1x32x128xf32>
    %31 = vector.shape_cast %30 : vector<1x32x128xf32> to vector<32x128xf32>
    %c0_22 = arith.constant 0 : index
    %c3_23 = arith.constant 3 : index
    %32 = vector.load %arg1[%c0_22, %c3_23] : memref<32x8xi32, #tpu.memory_space<vmem>>, vector<32x1xi32>
    %c0_i32_24 = arith.constant 0 : i32
    %33 = vector.broadcast %c0_i32_24 : i32 to vector<32x1xi32>
    %34 = arith.cmpi ne, %32, %33 : vector<32x1xi32>
    %cst_25 = arith.constant 0.000000e+00 : f32
    %35 = vector.shape_cast %34 : vector<32x1xi1> to vector<32x1xi1>
    %36 = vector.broadcast %35 : vector<32x1xi1> to vector<32x128xi1>
    %37 = vector.broadcast %cst_25 : f32 to vector<32x128xf32>
    %38 = arith.select %36, %31, %37 : vector<32x128xi1>, vector<32x128xf32>
    %c0_26 = arith.constant 0 : index
    %c384 = arith.constant 384 : index
    %39 = vector.load %arg3[%c0_26, %c384] : memref<32x1024xf32, #tpu.memory_space<vmem>>, vector<32x128xf32>
    tpu.vector_store %arg3[%c0_26, %c384], %38 {strides = array<i32>} : memref<32x1024xf32, #tpu.memory_space<vmem>>, vector<32x128xf32>,
    %c4 = arith.constant 4 : index
    %c0_27 = arith.constant 0 : index
    %c0_28 = arith.constant 0 : index
    %40 = vector.load %arg2[%c4, %c0_27, %c0_28] : memref<8x32x128xf32, #tpu.memory_space<vmem>>, vector<1x32x128xf32>
    %41 = vector.shape_cast %40 : vector<1x32x128xf32> to vector<32x128xf32>
    %c0_29 = arith.constant 0 : index
    %c4_30 = arith.constant 4 : index
    %42 = vector.load %arg1[%c0_29, %c4_30] : memref<32x8xi32, #tpu.memory_space<vmem>>, vector<32x1xi32>
    %c0_i32_31 = arith.constant 0 : i32
    %43 = vector.broadcast %c0_i32_31 : i32 to vector<32x1xi32>
    %44 = arith.cmpi ne, %42, %43 : vector<32x1xi32>
    %cst_32 = arith.constant 0.000000e+00 : f32
    %45 = vector.shape_cast %44 : vector<32x1xi1> to vector<32x1xi1>
    %46 = vector.broadcast %45 : vector<32x1xi1> to vector<32x128xi1>
    %47 = vector.broadcast %cst_32 : f32 to vector<32x128xf32>
    %48 = arith.select %46, %41, %47 : vector<32x128xi1>, vector<32x128xf32>
    %c0_33 = arith.constant 0 : index
    %c512 = arith.constant 512 : index
    %49 = vector.load %arg3[%c0_33, %c512] : memref<32x1024xf32, #tpu.memory_space<vmem>>, vector<32x128xf32>
    tpu.vector_store %arg3[%c0_33, %c512], %48 {strides = array<i32>} : memref<32x1024xf32, #tpu.memory_space<vmem>>, vector<32x128xf32>,
    %c5 = arith.constant 5 : index
    %c0_34 = arith.constant 0 : index
    %c0_35 = arith.constant 0 : index
    %50 = vector.load %arg2[%c5, %c0_34, %c0_35] : memref<8x32x128xf32, #tpu.memory_space<vmem>>, vector<1x32x128xf32>
    %51 = vector.shape_cast %50 : vector<1x32x128xf32> to vector<32x128xf32>
    %c0_36 = arith.constant 0 : index
    %c5_37 = arith.constant 5 : index
    %52 = vector.load %arg1[%c0_36, %c5_37] : memref<32x8xi32, #tpu.memory_space<vmem>>, vector<32x1xi32>
    %c0_i32_38 = arith.constant 0 : i32
    %53 = vector.broadcast %c0_i32_38 : i32 to vector<32x1xi32>
    %54 = arith.cmpi ne, %52, %53 : vector<32x1xi32>
    %cst_39 = arith.constant 0.000000e+00 : f32
    %55 = vector.shape_cast %54 : vector<32x1xi1> to vector<32x1xi1>
    %56 = vector.broadcast %55 : vector<32x1xi1> to vector<32x128xi1>
    %57 = vector.broadcast %cst_39 : f32 to vector<32x128xf32>
    %58 = arith.select %56, %51, %57 : vector<32x128xi1>, vector<32x128xf32>
    %c0_40 = arith.constant 0 : index
    %c640 = arith.constant 640 : index
    %59 = vector.load %arg3[%c0_40, %c640] : memref<32x1024xf32, #tpu.memory_space<vmem>>, vector<32x128xf32>
    tpu.vector_store %arg3[%c0_40, %c640], %58 {strides = array<i32>} : memref<32x1024xf32, #tpu.memory_space<vmem>>, vector<32x128xf32>,
    %c6 = arith.constant 6 : index
    %c0_41 = arith.constant 0 : index
    %c0_42 = arith.constant 0 : index
    %60 = vector.load %arg2[%c6, %c0_41, %c0_42] : memref<8x32x128xf32, #tpu.memory_space<vmem>>, vector<1x32x128xf32>
    %61 = vector.shape_cast %60 : vector<1x32x128xf32> to vector<32x128xf32>
    %c0_43 = arith.constant 0 : index
    %c6_44 = arith.constant 6 : index
    %62 = vector.load %arg1[%c0_43, %c6_44] : memref<32x8xi32, #tpu.memory_space<vmem>>, vector<32x1xi32>
    %c0_i32_45 = arith.constant 0 : i32
    %63 = vector.broadcast %c0_i32_45 : i32 to vector<32x1xi32>
    %64 = arith.cmpi ne, %62, %63 : vector<32x1xi32>
    %cst_46 = arith.constant 0.000000e+00 : f32
    %65 = vector.shape_cast %64 : vector<32x1xi1> to vector<32x1xi1>
    %66 = vector.broadcast %65 : vector<32x1xi1> to vector<32x128xi1>
    %67 = vector.broadcast %cst_46 : f32 to vector<32x128xf32>
    %68 = arith.select %66, %61, %67 : vector<32x128xi1>, vector<32x128xf32>
    %c0_47 = arith.constant 0 : index
    %c768 = arith.constant 768 : index
    %69 = vector.load %arg3[%c0_47, %c768] : memref<32x1024xf32, #tpu.memory_space<vmem>>, vector<32x128xf32>
    tpu.vector_store %arg3[%c0_47, %c768], %68 {strides = array<i32>} : memref<32x1024xf32, #tpu.memory_space<vmem>>, vector<32x128xf32>,
    %c7 = arith.constant 7 : index
    %c0_48 = arith.constant 0 : index
    %c0_49 = arith.constant 0 : index
    %70 = vector.load %arg2[%c7, %c0_48, %c0_49] : memref<8x32x128xf32, #tpu.memory_space<vmem>>, vector<1x32x128xf32>
    %71 = vector.shape_cast %70 : vector<1x32x128xf32> to vector<32x128xf32>
    %c0_50 = arith.constant 0 : index
    %c7_51 = arith.constant 7 : index
    %72 = vector.load %arg1[%c0_50, %c7_51] : memref<32x8xi32, #tpu.memory_space<vmem>>, vector<32x1xi32>
    %c0_i32_52 = arith.constant 0 : i32
    %73 = vector.broadcast %c0_i32_52 : i32 to vector<32x1xi32>
    %74 = arith.cmpi ne, %72, %73 : vector<32x1xi32>
    %cst_53 = arith.constant 0.000000e+00 : f32
    %75 = vector.shape_cast %74 : vector<32x1xi1> to vector<32x1xi1>
    %76 = vector.broadcast %75 : vector<32x1xi1> to vector<32x128xi1>
    %77 = vector.broadcast %cst_53 : f32 to vector<32x128xf32>
    %78 = arith.select %76, %71, %77 : vector<32x128xi1>, vector<32x128xf32>
    %c0_54 = arith.constant 0 : index
    %c896 = arith.constant 896 : index
    %79 = vector.load %arg3[%c0_54, %c896] : memref<32x1024xf32, #tpu.memory_space<vmem>>, vector<32x128xf32>
    tpu.vector_store %arg3[%c0_54, %c896], %78 {strides = array<i32>} : memref<32x1024xf32, #tpu.memory_space<vmem>>, vector<32x128xf32>,
    return
  }
  func.func @transform_0(%arg0: i32) -> (i32, i32) {
    %c0_i32 = arith.constant 0 : i32
    %c0_i32_0 = arith.constant 0 : i32
    return %arg0, %c0_i32 : i32, i32
  }
  func.func @transform_1(%arg0: i32) -> (i32, i32, i32) {
    %c0_i32 = arith.constant 0 : i32
    %c0_i32_0 = arith.constant 0 : i32
    %c0_i32_1 = arith.constant 0 : i32
    return %c0_i32, %arg0, %c0_i32_0 : i32, i32, i32
  }
  func.func @transform_2(%arg0: i32) -> (i32, i32) {
    %c0_i32 = arith.constant 0 : i32
    %c0_i32_0 = arith.constant 0 : i32
    return %arg0, %c0_i32 : i32, i32
  }
}

</mosaic_0001>

<bundles_post_ra>
// kernel: tpu_custom_call.1
= control target key start
LH: loop header
LB: loop body
LE: loop exit
PB: predicated region body
PF: predicated region fallthrough
CT: control target
= control target key end

     0   :  { %7 = vsyncpa [#allocation3], 0  ;;  %s1136_s0 = inlined_call_operand.vmem [shape: s32[300,8], index: 0, kind: input, shape index: {}]   ;;  %s1137_s1 = inlined_call_operand.hbm [shape: f32[12,320,128], index: 1, kind: input, shape index: {}]   ;;  %s1138_s2 = inlined_call_operand.hbm [shape: f32[300,1024], index: 2, kind: output, shape index: {}]  }
   0x1   :  { %9 = vsyncpa [#allocation3 + $0x1], 0 }
   0x2   :  { %10 = vsyncpa [#allocation4], 0 }
   0x3   :  { %12 = vsyncpa [#allocation4 + $0x1], 0  ;;  %s905_s9 = smov 0   ;;  %s907_s10 = smov 0  }
   0x4   :  { %s909_s11 = smov 0   ;;  %s911_s12 = smov 0  }
   0x5 LB: > { %s926_s13 = sadd.s32 4294967295, %s871_s12   ;;  %s670_s14 = sadd.s32 4294967294, %s871_s12   ;;  %s871_s12 = sphi %s911_s12, %s1146_s12   ;;  %s867_s11 = sphi %s909_s11, %s1145_s11   ;;  %s863_s10 = sphi %s907_s10, %s1144_s10   ;;  %s859_s9 = sphi %s905_s9, %s1143_s9  }
   0x6   : > { %s930_s15 = sadd.s32 1, %s871_s12   ;;  %s51_s16 = sadd.s32 1, %s867_s11 }
   0x7   : > { %s48_s17 = ssub.s32 %s871_s12, %s930_s15  ;;  %p58_p0 = scmp.ne.s32.totalorder %s867_s11, %s863_s10 }
   0x8   : > { %p49_p1 = scmp.eq.s32.totalorder %s48_s17, 0  ;;  %p59_p2 = scmp.eq.s32.totalorder %s871_s12, 0 }
   0x9   : > { %p64_p3 = scmp.ne.s32.totalorder %s863_s10, %s859_s9  ;;  %p65_p4 = scmp.eq.s32.totalorder %s926_s13, 0 }
   0xa   : > { %s942_s18 = scalar_select %p49_p1, %s867_s11, %s51_s16  }
   0xb   : > { %p944_p5 = por %p59_p2, %p58_p0  ;;  %p948_p6 = por %p65_p4, %p64_p3 }
   0xc   : > { %p88_p7 = scmp.eq.s32.totalorder %s926_s13, 9  ;;  %p94_p8 = scmp.eq.s32.totalorder %s670_s14, 9 }
   0xd   : > { %p672_p11 = scmp.ge.s32.totalorder %s871_s12, 10 }
   0xe   : > { %p953_p9 = por %p88_p7, %p58_p0  ;;  %p957_p10 = por %p94_p8, %p64_p3 }
   0xf   : > { %110 = sbr.rel (%p672_p11) target bundleno = 35 (0x23), region = 16 }
  0x16   : > { %s131_s23 = sand.u32 1, %s867_s11   ;;  %s722_s24 = sshll.u32 %s871_s12, 9 }
  0x17   : > { %s673_s25 = sshll.u32 %s131_s23, 8  ;;  %s141_s28 = scalar_lea.hbm %s1137_s1, %s722_s24 }
  0x18   : > { %s726_s29 = scalar_select %p944_p5, [#allocation0], [#allocation8] }
  0x19   : > { %s135_s30 = scalar_lea.vmem [#allocation2], %s673_s25  ;;  %s873_s5 = smov 5120  }
  0x1a   : > { %s154_s3 = sshll.u32 %s135_s30, 4  ;;  %s146_s4 = sld [smem:[%s726_s29]]   ;;  %s155_s3 = int_to_ptr.vmem [resolvable:$true] %s154_s3 }
  0x1b   : > { %727 = sst [smem:[#allocation7]] (%p944_p5), %s873_s5  ;;  %s874_s6 = smov 512  }
  0x1c   : > { %728 = sst [smem:[#allocation7 + $0x1]] (%p944_p5), %s874_s6  ;;  %s875_s7 = smov 4  }
  0x1d   : > { %729 = sst [smem:[#allocation7 + $0x2]] (%p944_p5), %s875_s7  ;;  %s876_s8 = smov 128  }
  0x1e   : > { %730 = sst [smem:[#allocation7 + $0x3]] (%p944_p5), %s876_s8  ;;  %s877_s16 = smov 8  }
  0x1f   : > { %731 = sst [smem:[#allocation7 + $0x4]] (%p944_p5), %s876_s8  ;;  %s132_s24 = scalar_lea.sflag [#allocation3], %s131_s23 }
  0x20   : > { %s676_s14 = sshll.u32 %s146_s4, 26  ;;  %732 = sst [smem:[#allocation7 + $0x5]] (%p944_p5), %s877_s16 }
  0x21   : > { %s677_s17 = sadd.s32 134217728, %s676_s14  ;;  %s878_s25 = smov [#allocation6]  }
  0x22   : > { %733 = dma.general (%p944_p5), %s141_s28, 4096, %s155_s3, %s132_s24, %s878_s25, [#allocation7], %s677_s17, 0  }
  0x23 PF: > { %p678_p12 = scmp.ge.s32.totalorder %s871_s12, 1  ;;  %p175_p13 = scmp.lt.s32.totalorder %s871_s12, 11 }
  0x25   : > { %p176_p0 = pnand %p678_p12, %p175_p13 }
  0x26   : > { %s986_s26 = sand.u32 (!%p176_p0), 1, %s863_s10  }
  0x27   : > { %179 = sbr.rel (%p176_p0) target bundleno = 295 (0x127), region = 28  ;;  %s679_s27 = sshll.u32 (!%p176_p0), %s986_s26, 8 }
  0x28   : > { %s182_s29 = scalar_lea.sflag (!%p176_p0), [#allocation3], %s986_s26  ;;  %s992_s23 = scalar_lea.vmem (!%p176_p0), [#allocation2], %s679_s27 }
  0x2e   : > { %850 = dma.done.wait (%p948_p6), %s182_s29, 4096  }
  0x2f   : > { %852 = vsyncadd (%p948_p6), %s182_s29, 4294963200  ;;  %s999_s19 = sshll.u32 %s926_s13, 2  ;;  %v879_v0 = vmov 0   ;;  %v880_v9 = vmov 1   ;;  %v881_v10 = vmov 2   ;;  %v882_v11 = vmov 3  }
  0x30   : > { %790 = vset.pattern.permute.xlu1 %v879_v0  ;;  %p220_p1 = scmp.lt.s32.totalorder %s999_s19, 37  ;;  %789 = vset.pattern.permute.xlu0 %v879_v0  ;;  %v883_v12 = vmov 4   ;;  %v884_v13 = vmov 5   ;;  %v885_v14 = vmov 6   ;;  %v886_v15 = vmov 7   ;;  %v238_v16 = vld [vmem:[%s992_s23 + $0x10] sm:$0xff] }
  0x31   : > { %v236_v18 = vld [vmem:[%s992_s23] sm:$0xff]  ;;  %s1010_s20 = scalar_lea.vmem [#allocation5], %s679_s27  ;;  %v239_v21 = vld [vmem:[%s992_s23 + $0x18] sm:$0xff]  ;;  %v237_v24 = vld [vmem:[%s992_s23 + $0x8] sm:$0xff]  ;;  %s564_s6 = scalar_lea.sflag [#allocation4], %s986_s26 }
  0x32   : > { %s221_s28 = scalar_select %p220_p1, %s999_s19, 37  ;;  %v684_v28 = vld [vmem:[%s992_s23 + $0x28] sm:$0xff]  ;;  %v683_v30 = vld [vmem:[%s992_s23 + $0x20] sm:$0xff]  ;;  %v685_v33 = vld [vmem:[%s992_s23 + $0x30] sm:$0xff] }
  0x33   : > { %v686_v36 = vld [vmem:[%s992_s23 + $0x38] sm:$0xff]  ;;  %v687_v40 = vld [vmem:[%s992_s23 + $0x40] sm:$0xff]  ;;  %v688_v42 = vld [vmem:[%s992_s23 + $0x48] sm:$0xff]  ;;  %s572_s7 = ssub.s32 (%p953_p9), 38, %s999_s19 }
  0x34   : > { %s682_s30 = sshll.u32 %s221_s28, 3  ;;  %v689_v45 = vld [vmem:[%s992_s23 + $0x50] sm:$0xff]  ;;  %v691_v48 = vld [vmem:[%s992_s23 + $0x60] sm:$0xff]  ;;  %v690_v51 = vld [vmem:[%s992_s23 + $0x58] sm:$0xff]  ;;  %p573_p2 = scmp.lt.s32.totalorder (%p953_p9), %s572_s7, 4 }
  0x35   : > { %s223_s5 = scalar_lea.vmem %s1136_s0, %s682_s30  ;;  %v694_v54 = vld [vmem:[%s992_s23 + $0x78] sm:$0xff]  ;;  %v692_v57 = vld [vmem:[%s992_s23 + $0x68] sm:$0xff]  ;;  %v693_v63 = vld [vmem:[%s992_s23 + $0x70] sm:$0xff] }
  0x36   : > { %v242_v1 = vld [vmem:[%s223_s5 + $0x10] sm:$0xff]  ;;  %v243_v2 = vld [vmem:[%s223_s5 + $0x18] sm:$0xff]  ;;  %v282_v3 = vld [vmem:[%s223_s5 + $0x8] sm:$0xff] }
  0x37   : > { %vm246_vm0 = vcmp.ne.s32.totalorder %v242_v1, 0  ;;  %vm247_vm1 = vcmp.ne.s32.totalorder %v243_v2, 0  ;;  %v322_v4 = vld [vmem:[%s223_s5] sm:$0xff]  ;;  %vm286_vm3 = vcmp.ne.s32.totalorder %v282_v3, 0  ;;  %v696_v60 = vld [vmem:[%s992_s23 + $0x88] sm:$0xff] }
  0x38   : > { %v250_v5 = vsel %vm246_vm0, 1, %v879_v0  ;;  %vm326_vm2 = vcmp.ne.s32.totalorder %v322_v4, 0  ;;  %v251_v7 = vsel %vm247_vm1, 1, %v879_v0  ;;  %v290_v8 = vsel %vm286_vm3, 1, %v879_v0  ;;  %v699_v3 = vld [vmem:[%s992_s23 + $0xa0] sm:$0xff] }
  0x39   : > { %259 = vperm.xlu1 %790, %v250_v5   ;;  %v330_v6 = vsel %vm326_vm2, 1, %v879_v0 }
  0x3a   : > { %253 = vperm.xlu0 %789, %v330_v6  }
  0x3d   : > { %262 = vperm.xlu1 %790, %v251_v7  }
  0x3e   : > { %256 = vperm.xlu0 %789, %v290_v8  }
  0x41   : > { %792 = vset.pattern.permute.xlu1 %v880_v9 }
  0x42   : > { %297 = vperm.xlu1 %792, %v290_v8   ;;  %791 = vset.pattern.permute.xlu0 %v880_v9 }
  0x43   : > { %294 = vperm.xlu0 %791, %v330_v6  }
  0x46   : > { %300 = vperm.xlu1 %792, %v250_v5  }
  0x47   : > { %303 = vperm.xlu0 %791, %v251_v7  }
  0x4a   : > { %793 = vset.pattern.permute.xlu1 %v881_v10 }
  0x4b   : > { %335 = vperm.xlu1 %793, %v330_v6   ;;  %794 = vset.pattern.permute.xlu0 %v881_v10 }
  0x4c   : > { %338 = vperm.xlu0 %794, %v290_v8  }
  0x4f   : > { %341 = vperm.xlu1 %793, %v250_v5  }
  0x50   : > { %795 = vset.pattern.permute.xlu0 %v882_v11 }
  0x51   : > { %376 = vperm.xlu0 %795, %v330_v6  }
  0x53   : > { %344 = vperm.xlu1 %793, %v251_v7  }
  0x55   : > { %385 = vperm.xlu0 %795, %v251_v7  }
  0x57   : > { %796 = vset.pattern.permute.xlu1 %v882_v11  ;;  %v697_v11 = vld [vmem:[%s992_s23 + $0x90] sm:$0xff] }
  0x58   : > { %379 = vperm.xlu1 %796, %v290_v8  }
  0x59   : > { %798 = vset.pattern.permute.xlu0 %v883_v12 }
  0x5a   : > { %420 = vperm.xlu0 %798, %v290_v8  }
  0x5c   : > { %382 = vperm.xlu1 %796, %v250_v5  }
  0x5e   : > { %799 = vset.pattern.permute.xlu0 %v884_v13 }
  0x5f   : > { %458 = vperm.xlu0 %799, %v330_v6  }
  0x60   : > { %797 = vset.pattern.permute.xlu1 %v883_v12 }
  0x61   : > { %417 = vperm.xlu1 %797, %v330_v6  }
  0x63   : > { %467 = vperm.xlu0 %799, %v251_v7  }
  0x65   : > { %423 = vperm.xlu1 %797, %v250_v5  }
  0x67   : > { %802 = vset.pattern.permute.xlu0 %v885_v14 }
  0x68   : > { %502 = vperm.xlu0 %802, %v290_v8  }
  0x69   : > { %426 = vperm.xlu1 %797, %v251_v7  }
  0x6c   : > { %803 = vset.pattern.permute.xlu0 %v886_v15 }
  0x6d   : > { %800 = vset.pattern.permute.xlu1 %v884_v13  ;;  %540 = vperm.xlu0 %803, %v330_v6  }
  0x6e   : > { %461 = vperm.xlu1 %800, %v290_v8  }
  0x71   : > { %549 = vperm.xlu0 %803, %v251_v7  }
  0x72   : > { %464 = vperm.xlu1 %800, %v250_v5  }
  0x76   : > { %801 = vset.pattern.permute.xlu1 %v885_v14 }
  0x77   : > { %499 = vperm.xlu1 %801, %v330_v6  }
  0x7b   : > { %505 = vperm.xlu1 %801, %v250_v5  }
  0x7f   : > { %508 = vperm.xlu1 %801, %v251_v7  }
  0x83   : > { %804 = vset.pattern.permute.xlu1 %v886_v15  ;;  %v704_v15 = vld [vmem:[%s992_s23 + $0xc8] sm:$0xff] }
  0x84   : > { %543 = vperm.xlu1 %804, %v290_v8   ;;  %v702_v8 = vld [vmem:[%s992_s23 + $0xb8] sm:$0xff] }
  0x88   : > { %546 = vperm.xlu1 %804, %v250_v5   ;;  %v695_v5 = vld [vmem:[%s992_s23 + $0x80] sm:$0xff] }
  0xb8   : > { %v260_v17 = vpop.permute.xlu1 %259 }
  0xb9   : > { %vm266_vm4 = vcmp.eq.s32.totalorder %v260_v17, 1  ;;  %v254_v19 = vpop.permute.xlu0 %253 }
  0xba   : > { %v270_v20 = vsel %vm266_vm4, %v238_v16, 0.0  ;;  %vm264_vm5 = vcmp.eq.s32.totalorder %v254_v19, 1  ;;  %v698_v16 = vld [vmem:[%s992_s23 + $0x98] sm:$0xff] }
  0xbb   : > { %274 = vst [vmem:[%s1010_s20 + $0x80] sm:$0xff] %v270_v20  ;;  %v268_v22 = vsel %vm264_vm5, %v236_v18, 0.0 }
  0xbc   : > { %v263_v23 = vpop.permute.xlu1 %262  ;;  %272 = vst [vmem:[%s1010_s20] sm:$0xff] %v268_v22  ;;  %v700_v22 = vld [vmem:[%s992_s23 + $0xa8] sm:$0xff] }
  0xbd   : > { %vm267_vm6 = vcmp.eq.s32.totalorder %v263_v23, 1  ;;  %v257_v25 = vpop.permute.xlu0 %256 }
  0xbe   : > { %v271_v26 = vsel %vm267_vm6, %v239_v21, 0.0  ;;  %vm265_vm7 = vcmp.eq.s32.totalorder %v257_v25, 1  ;;  %v707_v21 = vld [vmem:[%s992_s23 + $0xe0] sm:$0xff] }
  0xbf   : > { %275 = vst [vmem:[%s1010_s20 + $0xc0] sm:$0xff] %v271_v26  ;;  %v269_v27 = vsel %vm265_vm7, %v237_v24, 0.0 }
  0xc0   : > { %273 = vst [vmem:[%s1010_s20 + $0x40] sm:$0xff] %v269_v27  ;;  %v710_v27 = vld [vmem:[%s992_s23 + $0xf8] sm:$0xff] }
  0xc1   : > { %v298_v29 = vpop.permute.xlu1 %297 }
  0xc2   : > { %vm306_vm8 = vcmp.eq.s32.totalorder %v298_v29, 1  ;;  %v295_v31 = vpop.permute.xlu0 %294 }
  0xc3   : > { %v310_v32 = vsel %vm306_vm8, %v684_v28, 0.0  ;;  %vm305_vm9 = vcmp.eq.s32.totalorder %v295_v31, 1  ;;  %v701_v28 = vld [vmem:[%s992_s23 + $0xb0] sm:$0xff] }
  0xc4   : > { %314 = vst [vmem:[%s1010_s20 + $0x48] sm:$0xff] %v310_v32  ;;  %v309_v34 = vsel %vm305_vm9, %v683_v30, 0.0 }
  0xc5   : > { %v301_v35 = vpop.permute.xlu1 %300  ;;  %313 = vst [vmem:[%s1010_s20 + $0x8] sm:$0xff] %v309_v34 }
  0xc6   : > { %vm307_vm10 = vcmp.eq.s32.totalorder %v301_v35, 1  ;;  %v304_v37 = vpop.permute.xlu0 %303 }
  0xc7   : > { %v311_v38 = vsel %vm307_vm10, %v685_v33, 0.0  ;;  %vm308_vm11 = vcmp.eq.s32.totalorder %v304_v37, 1  ;;  %v703_v33 = vld [vmem:[%s992_s23 + $0xc0] sm:$0xff] }
  0xc8   : > { %315 = vst [vmem:[%s1010_s20 + $0x88] sm:$0xff] %v311_v38  ;;  %v312_v39 = vsel %vm308_vm11, %v686_v36, 0.0  ;;  %v705_v36 = vld [vmem:[%s992_s23 + $0xd0] sm:$0xff] }
  0xc9   : > { %316 = vst [vmem:[%s1010_s20 + $0xc8] sm:$0xff] %v312_v39  ;;  %v706_v39 = vld [vmem:[%s992_s23 + $0xd8] sm:$0xff] }
  0xca   : > { %v336_v41 = vpop.permute.xlu1 %335 }
  0xcb   : > { %vm346_vm12 = vcmp.eq.s32.totalorder %v336_v41, 1  ;;  %v339_v43 = vpop.permute.xlu0 %338 }
  0xcc   : > { %v350_v44 = vsel %vm346_vm12, %v687_v40, 0.0  ;;  %vm347_vm13 = vcmp.eq.s32.totalorder %v339_v43, 1 }
  0xcd   : > { %354 = vst [vmem:[%s1010_s20 + $0x10] sm:$0xff] %v350_v44  ;;  %v351_v46 = vsel %vm347_vm13, %v688_v42, 0.0  ;;  %v708_v42 = vld [vmem:[%s992_s23 + $0xe8] sm:$0xff] }
  0xce   : > { %v342_v47 = vpop.permute.xlu1 %341  ;;  %355 = vst [vmem:[%s1010_s20 + $0x50] sm:$0xff] %v351_v46 }
  0xcf   : > { %vm348_vm14 = vcmp.eq.s32.totalorder %v342_v47, 1 }
  0xd0   : > { %v352_v49 = vsel %vm348_vm14, %v689_v45, 0.0  ;;  %v377_v50 = vpop.permute.xlu0 %376  ;;  %v709_v45 = vld [vmem:[%s992_s23 + $0xf0] sm:$0xff] }
  0xd1   : > { %356 = vst [vmem:[%s1010_s20 + $0x90] sm:$0xff] %v352_v49  ;;  %vm387_vm15 = vcmp.eq.s32.totalorder %v377_v50, 1 }
  0xd2   : > { %v345_v52 = vpop.permute.xlu1 %344  ;;  %v391_v53 = vsel %vm387_vm15, %v691_v48, 0.0 }
  0xd3   : > { %vm349_vm0 = vcmp.eq.s32.totalorder %v345_v52, 1  ;;  %395 = vst [vmem:[%s1010_s20 + $0x18] sm:$0xff] %v391_v53 }
  0xd4   : > { %v353_v55 = vsel %vm349_vm0, %v690_v51, 0.0  ;;  %v386_v56 = vpop.permute.xlu0 %385 }
  0xd5   : > { %357 = vst [vmem:[%s1010_s20 + $0xd0] sm:$0xff] %v353_v55  ;;  %vm390_vm1 = vcmp.eq.s32.totalorder %v386_v56, 1 }
  0xd6   : > { %v394_v58 = vsel %vm390_vm1, %v694_v54, 0.0 }
  0xd7   : > { %v380_v59 = vpop.permute.xlu1 %379  ;;  %398 = vst [vmem:[%s1010_s20 + $0xd8] sm:$0xff] %v394_v58 }
  0xd8   : > { %vm388_vm2 = vcmp.eq.s32.totalorder %v380_v59, 1 }
  0xd9   : > { %v392_v61 = vsel %vm388_vm2, %v692_v57, 0.0  ;;  %v421_v62 = vpop.permute.xlu0 %420 }
  0xda   : > { %396 = vst [vmem:[%s1010_s20 + $0x58] sm:$0xff] %v392_v61  ;;  %vm429_vm3 = vcmp.eq.s32.totalorder %v421_v62, 1 }
  0xdb   : > { %v383_v0 = vpop.permute.xlu1 %382  ;;  %v433_v1 = vsel %vm429_vm3, %v696_v60, 0.0 }
  0xdc   : > { %vm389_vm4 = vcmp.eq.s32.totalorder %v383_v0, 1  ;;  %437 = vst [vmem:[%s1010_s20 + $0x60] sm:$0xff] %v433_v1 }
  0xdd   : > { %v393_v2 = vsel %vm389_vm4, %v693_v63, 0.0 }
  0xde   : > { %397 = vst [vmem:[%s1010_s20 + $0x98] sm:$0xff] %v393_v2  ;;  %v459_v4 = vpop.permute.xlu0 %458 }
  0xdf   : > { %vm469_vm5 = vcmp.eq.s32.totalorder %v459_v4, 1 }
  0xe0   : > { %v418_v6 = vpop.permute.xlu1 %417  ;;  %v473_v7 = vsel %vm469_vm5, %v699_v3, 0.0 }
  0xe1   : > { %vm428_vm6 = vcmp.eq.s32.totalorder %v418_v6, 1  ;;  %477 = vst [vmem:[%s1010_s20 + $0x28] sm:$0xff] %v473_v7 }
  0xe2   : > { %v432_v9 = vsel %vm428_vm6, %v695_v5, 0.0  ;;  %v468_v10 = vpop.permute.xlu0 %467 }
  0xe3   : > { %436 = vst [vmem:[%s1010_s20 + $0x20] sm:$0xff] %v432_v9  ;;  %vm472_vm7 = vcmp.eq.s32.totalorder %v468_v10, 1 }
  0xe4   : > { %v424_v12 = vpop.permute.xlu1 %423  ;;  %v476_v13 = vsel %vm472_vm7, %v702_v8, 0.0 }
  0xe5   : > { %vm430_vm8 = vcmp.eq.s32.totalorder %v424_v12, 1  ;;  %480 = vst [vmem:[%s1010_s20 + $0xe8] sm:$0xff] %v476_v13 }
  0xe6   : > { %v434_v14 = vsel %vm430_vm8, %v697_v11, 0.0 }
  0xe7   : > { %438 = vst [vmem:[%s1010_s20 + $0xa0] sm:$0xff] %v434_v14  ;;  %v503_v17 = vpop.permute.xlu0 %502 }
  0xe8   : > { %v427_v18 = vpop.permute.xlu1 %426  ;;  %vm511_vm9 = vcmp.eq.s32.totalorder %v503_v17, 1 }
  0xe9   : > { %vm431_vm10 = vcmp.eq.s32.totalorder %v427_v18, 1  ;;  %v515_v19 = vsel %vm511_vm9, %v704_v15, 0.0 }
  0xea   : > { %v435_v20 = vsel %vm431_vm10, %v698_v16, 0.0  ;;  %519 = vst [vmem:[%s1010_s20 + $0x70] sm:$0xff] %v515_v19 }
  0xeb   : > { %439 = vst [vmem:[%s1010_s20 + $0xe0] sm:$0xff] %v435_v20 }
  0xec   : > { %v541_v23 = vpop.permute.xlu0 %540 }
  0xed   : > { %v462_v24 = vpop.permute.xlu1 %461  ;;  %vm551_vm11 = vcmp.eq.s32.totalorder %v541_v23, 1 }
  0xee   : > { %vm470_vm12 = vcmp.eq.s32.totalorder %v462_v24, 1  ;;  %v555_v25 = vsel %vm551_vm11, %v707_v21, 0.0 }
  0xef   : > { %v474_v26 = vsel %vm470_vm12, %v700_v22, 0.0  ;;  %559 = vst [vmem:[%s1010_s20 + $0x38] sm:$0xff] %v555_v25 }
  0xf0   : > { %478 = vst [vmem:[%s1010_s20 + $0x68] sm:$0xff] %v474_v26  ;;  %v550_v29 = vpop.permute.xlu0 %549 }
  0xf1   : > { %v465_v30 = vpop.permute.xlu1 %464  ;;  %vm554_vm13 = vcmp.eq.s32.totalorder %v550_v29, 1 }
  0xf2   : > { %vm471_vm14 = vcmp.eq.s32.totalorder %v465_v30, 1  ;;  %v558_v31 = vsel %vm554_vm13, %v710_v27, 0.0 }
  0xf3   : > { %v475_v32 = vsel %vm471_vm14, %v701_v28, 0.0  ;;  %562 = vst [vmem:[%s1010_s20 + $0xf8] sm:$0xff] %v558_v31 }
  0xf4   : > { %479 = vst [vmem:[%s1010_s20 + $0xa8] sm:$0xff] %v475_v32 }
  0xf6   : > { %v500_v34 = vpop.permute.xlu1 %499 }
  0xf7   : > { %vm510_vm15 = vcmp.eq.s32.totalorder %v500_v34, 1 }
  0xf8   : > { %v514_v35 = vsel %vm510_vm15, %v703_v33, 0.0 }
  0xf9   : > { %518 = vst [vmem:[%s1010_s20 + $0x30] sm:$0xff] %v514_v35 }
  0xfa   : > { %v506_v37 = vpop.permute.xlu1 %505 }
  0xfb   : > { %vm512_vm0 = vcmp.eq.s32.totalorder %v506_v37, 1 }
  0xfc   : > { %v516_v38 = vsel %vm512_vm0, %v705_v36, 0.0 }
  0xfd   : > { %520 = vst [vmem:[%s1010_s20 + $0xb0] sm:$0xff] %v516_v38 }
  0xfe   : > { %v509_v40 = vpop.permute.xlu1 %508 }
  0xff   : > { %vm513_vm1 = vcmp.eq.s32.totalorder %v509_v40, 1 }
 0x100   : > { %v517_v41 = vsel %vm513_vm1, %v706_v39, 0.0 }
 0x101   : > { %521 = vst [vmem:[%s1010_s20 + $0xf0] sm:$0xff] %v517_v41 }
 0x103   : > { %v544_v43 = vpop.permute.xlu1 %543 }
 0x104   : > { %vm552_vm2 = vcmp.eq.s32.totalorder %v544_v43, 1  ;;  %570 = sbr.rel (!%p953_p9) target bundleno = 295 (0x127), region = 36 }
 0x105   : > { %v556_v44 = vsel %vm552_vm2, %v708_v42, 0.0 }
 0x106   : > { %560 = vst [vmem:[%s1010_s20 + $0x78] sm:$0xff] %v556_v44 }
 0x107   : > { %v547_v46 = vpop.permute.xlu1 %546 }
 0x108   : > { %vm553_vm3 = vcmp.eq.s32.totalorder %v547_v46, 1 }
 0x109   : > { %v557_v47 = vsel %vm553_vm3, %v709_v45, 0.0 }
 0x10a   : > { %561 = vst [vmem:[%s1010_s20 + $0xb8] sm:$0xff] %v557_v47 }
 0x10b   : > { %s1148_s7 = smov (!%p573_p2, %s572_s7), 4 }
 0x10c   : > { %s1078_s8 = sshll.u32 %s1148_s7, 10 }
 0x10d   : > { %s578_s14 = ssub.s32 4096, %s1078_s8 }
 0x10e   : > { %579 = vsyncadd %s564_s6, %s578_s14  ;;  %p715_p3 = scmp.ne.s32.totalorder %s1078_s8, 0  ;;  %s725_s16 = sshll.u32 %s926_s13, 12 }
 0x10f   : > { %s1088_s24 = scalar_lea.hbm %s1138_s2, %s725_s16  ;;  %s585_s25 = sshll.u32 %s1010_s20, 4  ;;  %s1091_s25 = int_to_ptr.vmem [resolvable:$true] %s585_s25 }
 0x110   : > { %s805_s27 = scalar_lea.vmem %s1091_s25, %s1078_s8  ;;  %s887_s29 = smov [#allocation5]  }
 0x111   : > { %p806_p4 = scmp.ne.s32.totalorder %s1091_s25, %s805_s27  ;;  %s809_s23 = sshll.u32 %s887_s29, 4  ;;  %s810_s23 = int_to_ptr.vmem [resolvable:$false] %s809_s23 }
 0x112   : > { %s811_s13 = scalar_lea.vmem %s810_s23, 8192  ;;  %p812_p7 = scmp.lt.s32.totalorder %s1091_s25, %s810_s23 }
 0x113   : > { %p807_p5 = pnand %p806_p4, %p715_p3  ;;  %p813_p8 = scmp.lt.s32.totalorder %s811_s13, %s805_s27 }
 0x115   : > { %p808_p6 = pneg %p807_p5  ;;  %p814_p9 = por %p813_p8, %p812_p7 }
 0x117   : > { %p815_p11 = pnand %p814_p9, %p808_p6 }
 0x119   : > { %818 = shalt.err (!%p815_p11)
}
 0x11a   : > { %s819_s19 = scalar_lea.hbm %s1088_s24, %s1078_s8  ;;  %s823_s3 = scalar_lea.hbm %s1138_s2, 38912 }
 0x11b   : > { %p820_p12 = scmp.ne.s32.totalorder %s1088_s24, %s819_s19  ;;  %p824_p1 = scmp.lt.u32.totalorder %s1088_s24, %s1138_s2 }
 0x11c   : > { %p825_p2 = scmp.lt.u32.totalorder %s823_s3, %s819_s19  ;;  %p827_p5 = scmp.lt.u32.totalorder %s819_s19, %s1088_s24 }
 0x11d   : > { %p821_p13 = pnand %p820_p12, %p715_p3 }
 0x11e   : > { %p826_p4 = por %p825_p2, %p824_p1 }
 0x11f   : > { %p822_p0 = pneg %p821_p13 }
 0x120   : > { %p828_p6 = por %p827_p5, %p826_p4 }
 0x122   : > { %p829_p7 = pnand %p828_p6, %p822_p0 }
 0x124   : > { %832 = shalt.err (!%p829_p7)
}
 0x125   : > { %s888_s20 = smov 1024   ;;  %s889_s7 = smov 64  }
 0x126   : > { %591 = dma.vmem_to_hbm [thread:$0]  (%p715_p3), %s1091_s25, %s1078_s8, %s1088_s24, %s564_s6, %s888_s20, %s888_s20, %s889_s7  }
 0x127 PF: > { %p740_p8 = scmp.ge.s32.totalorder %s871_s12, 2  ;;  %s600_s14 = sand.u32 1, %s859_s9  }
 0x128   : > { %s601_s16 = scalar_lea.sflag [#allocation4], %s600_s14 }
 0x129   : > { %p737_p9 = pnand %p740_p8, %p957_p10 }
 0x12b   : > { %854 = dma.done.wait (!%p737_p9), %s601_s16, 4096  }
 0x12c   : > { %856 = vsyncadd (!%p737_p9), %s601_s16, 4294963200  ;;  %p15_p11 = scmp.ge.s32.totalorder %s930_s15, 12   ;;  %s1143_s9 = smov %s863_s10 }
 0x12d   : > { %s1144_s10 = smov %s867_s11  ;;  %s1145_s11 = smov %s942_s18 }
 0x12e   : > { %s1146_s12 = smov %s930_s15  ;;  %17 = sbr.rel (!%p15_p11) target bundleno = 5 (0x5), region = 88 }
 0x135   :  { %606 = vsyncpa [#allocation3], 1 }
 0x136   :  { %608 = vsyncpa [#allocation3 + $0x1], 1 }
 0x137   :  { %609 = vsyncpa [#allocation4], 1 }
 0x138   :  { %611 = vsyncpa [#allocation4 + $0x1], 1 }

</bundles_post_ra>
